<compile_context>
chip_gen: v6e
topology: v6e:2x2x1
jax: 0.10.0
libtpu: 0.0.40
codegen_flags: <defaults>
</compile_context>

<pallas_src>
import functools
import math

import jax
import jax.numpy as jnp
import numpy as np
from jax import lax
from jax.experimental import pallas as pl
from jax.experimental.pallas import tpu as pltpu

_CHUNK_ROWS = 8            # sublane rows per inner-loop step (low vreg pressure)
_DEFAULT_BLOCK_ROWS = 512  # ~1.25 MiB per block for C=5 f32


@functools.cache
def _lane_shift_mode():
    """Resolve, once, how to shift data along lanes.

    Prefers pltpu.roll (one XLU op per vreg).  Its direction is probed on a
    multi-lane-tile array instead of relying on convention; if roll is not
    usable here we fall back to a slice+concatenate shift.
    """
    try:
        def probe(x_ref, o_ref):
            o_ref[...] = pltpu.roll(x_ref[...], 1, axis=-1)

        with jax.ensure_compile_time_eval():
            x = jnp.arange(8 * 640, dtype=jnp.float32).reshape(8, 640)
            y = pl.pallas_call(
                probe, out_shape=jax.ShapeDtypeStruct((8, 640), jnp.float32))(x)
            y = np.asarray(jax.block_until_ready(y))
        if y[0, 1] == 0.0:   # roll(x, s)[j] == x[j - s]   (jnp.roll direction)
            return "roll_jnp"
        if y[0, 1] == 2.0:   # roll(x, s)[j] == x[j + s]
            return "roll_rev"
        return "concat"
    except Exception:        # roll unavailable / not lowerable -> concat shift
        return "concat"


def _lane_shifter(mode, width):
    """Returns shift(p, d) with shift(p, d)[:, j] == p[:, (j + d) % width]."""
    if mode == "concat":
        def shift(p, d):
            if d == 0:
                return p
            k = d % width
            return jnp.concatenate([p[:, k:], p[:, :k]], axis=-1)
    else:
        sign = -1 if mode == "roll_jnp" else 1

        def shift(p, d):
            if d == 0:
                return p
            return pltpu.roll(p, (sign * d) % width, axis=-1)
    return shift


def _make_kernel(tm, row_width, shift_mode):
    """Kernel over one (tm, row_width) block of the flattened point stream."""
    shift = _lane_shifter(shift_mode, row_width)

    def kernel(w_ref, p_ref, o_ref):
        # w_ref: VMEM (6, row_width) f32 weight planes: rows 0..4 multiply the
        #        lane-shifted inputs for offsets d = -2..+2, row 5 is the
        #        additive (translation) plane.  Wrapped lanes of a shift always
        #        meet a zero weight, so wrap values are irrelevant.
        # p_ref / o_ref: VMEM (tm, row_width) interleaved-point blocks.
        w = w_ref[...]

        def apply_rows(r0, nrows):
            p = p_ref[pl.ds(r0, nrows), :].astype(jnp.float32)
            acc = p * w[2:3, :] + w[5:6, :]          # d = 0 term + bias
            acc = acc + shift(p, -2) * w[0:1, :]
            acc = acc + shift(p, -1) * w[1:2, :]
            acc = acc + shift(p, 1) * w[3:4, :]
            acc = acc + shift(p, 2) * w[4:5, :]
            o_ref[pl.ds(r0, nrows), :] = acc.astype(o_ref.dtype)

        n_full = tm // _CHUNK_ROWS
        rem = tm % _CHUNK_ROWS
        if n_full > 0:
            def body(i, carry):
                apply_rows(pl.multiple_of(i * _CHUNK_ROWS, _CHUNK_ROWS),
                           _CHUNK_ROWS)
                return carry
            lax.fori_loop(0, n_full, body, 0)
        if rem > 0:
            apply_rows(n_full * _CHUNK_ROWS, rem)

    return kernel


def _weight_planes(keyframe_pose_mat, n_channels, row_width):
    """Per-lane weight planes encoding the inverse-pose affine transform.

    For lane position j with channel c = j % C:
      c <  3 : out[j] = sum_i inv[c, i] * p[j - c + i] + inv[c, 3]
      c >= 3 : out[j] = p[j]            (pass-through 2D observation channels)
    Returns a (6, row_width) f32 array: rows 0..4 are the multiplier planes
    for lane offsets d = -2..+2, row 5 is the additive plane.
    """
    pose = keyframe_pose_mat.astype(jnp.float32)
    rot_inv = pose[:3, :3].T                 # R^T
    t_inv = -rot_inv @ pose[:3, 3:4]         # -R^T t, shape (3, 1)

    c = jnp.arange(row_width, dtype=jnp.int32) % n_channels
    cx = jnp.clip(c, 0, 2)
    planes = []
    for d in (-2, -1, 0, 1, 2):
        i = c + d
        valid = (c < 3) & (i >= 0) & (i < 3)
        w_d = jnp.where(valid, rot_inv[cx, jnp.clip(i, 0, 2)], 0.0)
        if d == 0:
            w_d = jnp.where(c >= 3, 1.0, w_d)   # identity for 2D channels
        planes.append(w_d)
    planes.append(jnp.where(c < 3, t_inv[cx, 0], 0.0))   # bias plane
    return jnp.stack(planes, axis=0).astype(jnp.float32)


@functools.partial(jax.jit, static_argnums=(2, 3))
def _update_points_jit(p3d2d, keyframe_pose_mat, block_rows, shift_mode):
    B, N, C = p3d2d.shape
    if C < 3:
        raise ValueError("p3d2d must have at least 3 channels (x, y, z).")
    dtype = p3d2d.dtype

    # Row width = lcm(C, 128): each 128-lane-aligned flat row holds a whole
    # number of points, so lane shifts never need to cross rows.
    row_width = C * (128 // math.gcd(C, 128))
    pts_per_row = row_width // C
    n_pad = pl.cdiv(N, pts_per_row) * pts_per_row

    x = p3d2d
    if n_pad != N:
        # Rare path (N not a multiple of 128 // gcd(C, 128)); one extra copy.
        x = jnp.pad(x, ((0, 0), (0, n_pad - N), (0, 0)))

    total_rows = (B * n_pad) // pts_per_row
    x_flat = x.reshape(total_rows, row_width)          # free row-major reshape

    weights = _weight_planes(keyframe_pose_mat, C, row_width)   # (6, row_width)

    # Block sizing: as large as reasonable to amortize per-step overhead, but
    # keep >= 4 grid steps when possible so both v7x TensorCores are fed.
    tm = min(total_rows, block_rows)
    while tm > 8 and pl.cdiv(total_rows, tm) < 4:
        tm //= 2
    if tm < total_rows:
        tm = max(8, (tm // 8) * 8)

    grid = (pl.cdiv(total_rows, tm),)
    out_flat = pl.pallas_call(
        _make_kernel(tm, row_width, shift_mode),
        out_shape=jax.ShapeDtypeStruct((total_rows, row_width), dtype),
        grid_spec=pltpu.PrefetchScalarGridSpec(
            num_scalar_prefetch=0,
            grid=grid,
            in_specs=[
                pl.BlockSpec((6, row_width), lambda n: (0, 0)),    # weights
                pl.BlockSpec((tm, row_width), lambda n: (n, 0)),   # points
            ],
            out_specs=pl.BlockSpec((tm, row_width), lambda n: (n, 0)),
        ),
        compiler_params=pltpu.CompilerParams(
            dimension_semantics=("parallel",),
        ),
    )(weights, x_flat)

    out = out_flat.reshape(B, n_pad, C)
    if n_pad != N:
        out = out[:, :N, :]
    return {"p3d2d_keyframe": out}


def update_points_to_keyframe(p3d2d, keyframe_pose_mat, *,
                              block_rows=_DEFAULT_BLOCK_ROWS):
    """Returns {'p3d2d_keyframe': [B, N, C]} matching the PyTorch module."""
    shift_mode = _lane_shift_mode()   # resolved eagerly (outside the jit trace)
    return _update_points_jit(p3d2d, keyframe_pose_mat, block_rows, shift_mode)


def _reference(p3d2d, keyframe_pose_mat):
    """Pure-JAX replica of the PyTorch forward for verification."""
    p3d_h = jnp.concatenate(
        [p3d2d[:, :, :3], jnp.ones_like(p3d2d[:, :, :1])], axis=-1)   # (B, N, 4)
    R = keyframe_pose_mat[:3, :3]
    t = keyframe_pose_mat[:3, 3:4]
    Rt = jnp.transpose(R)
    inv = jnp.eye(4, dtype=keyframe_pose_mat.dtype)
    inv = inv.at[:3, :3].set(Rt)
    inv = inv.at[:3, 3:4].set(-Rt @ t)
    p3d_key = jnp.swapaxes(inv @ jnp.swapaxes(p3d_h, -2, -1), -2, -1)[:, :, :3]
    return p3d2d.at[:, :, :3].set(p3d_key)


if __name__ == "__main__":
    key = jax.random.PRNGKey(0)
    k_pts, k_rot, k_trans, k_pts2 = jax.random.split(key, 4)

    # Deterministic rigid keyframe pose: orthonormal R (via QR) + translation.
    A = jax.random.normal(k_rot, (3, 3), dtype=jnp.float32)
    Q, _ = jnp.linalg.qr(A)
    trans = jax.random.normal(k_trans, (3, 1), dtype=jnp.float32)
    keyframe_pose = jnp.eye(4, dtype=jnp.float32)
    keyframe_pose = keyframe_pose.at[:3, :3].set(Q)
    keyframe_pose = keyframe_pose.at[:3, 3:4].set(trans)

    # Main check: C = 5 (x, y, z, u, v); N not a multiple of 128 exercises the
    # padding path flagged in the review.
    B, N, C = 2, 200, 5
    p3d2d = jax.random.normal(k_pts, (B, N, C), dtype=jnp.float32) * 5.0
    out = update_points_to_keyframe(p3d2d, keyframe_pose)
    result = jax.block_until_ready(out["p3d2d_keyframe"])
    np.testing.assert_allclose(np.asarray(result),
                               np.asarray(_reference(p3d2d, keyframe_pose)),
                               rtol=1e-5, atol=1e-5)

    # Edge case from the review: C == 3 exactly (no pass-through channels).
    p3d = jax.random.normal(k_pts2, (1, 128, 3), dtype=jnp.float32) * 5.0
    out3 = update_points_to_keyframe(p3d, keyframe_pose)
    result3 = jax.block_until_ready(out3["p3d2d_keyframe"])
    np.testing.assert_allclose(np.asarray(result3),
                               np.asarray(_reference(p3d, keyframe_pose)),
                               rtol=1e-5, atol=1e-5)

    print("KERNEL_OK")
</pallas_src>

<mosaic_0001>
module attributes {stable_mosaic.version = 11 : i64} {
  func.func @kernel(%arg0: i32, %arg1: memref<6x640xf32, #tpu.memory_space<vmem>>, %arg2: memref<4x640xf32, #tpu.memory_space<vmem>>, %arg3: memref<4x640xf32, #tpu.memory_space<vmem>>) attributes {dimension_semantics = [#tpu.dimension_semantics<parallel>], iteration_bounds = array<i64: 1>, scalar_prefetch = 0 : i64, scratch_operands = 0 : i64, tpu.core_type = #tpu.core_type<tc>, window_params = [{pipeline_mode = #tpu.pipeline_mode<synchronous>, transform_indices = @transform_0, window_bounds = array<i64: 6, 640>}, {transform_indices = @transform_1, window_bounds = array<i64: 4, 640>}, {transform_indices = @transform_2, window_bounds = array<i64: 4, 640>}]} {
    %c0 = arith.constant 0 : index
    %c0_0 = arith.constant 0 : index
    %0 = vector.load %arg1[%c0, %c0_0] : memref<6x640xf32, #tpu.memory_space<vmem>>, vector<6x640xf32>
    %c0_1 = arith.constant 0 : index
    %c0_2 = arith.constant 0 : index
    %1 = vector.load %arg2[%c0_1, %c0_2] : memref<4x640xf32, #tpu.memory_space<vmem>>, vector<4x640xf32>
    %2 = vector.extract_strided_slice %0 {offsets = [2, 0], sizes = [1, 640], strides = [1, 1]} : vector<6x640xf32> to vector<1x640xf32>
    %3 = vector.broadcast %2 : vector<1x640xf32> to vector<4x640xf32>
    %4 = arith.mulf %1, %3 : vector<4x640xf32>
    %5 = vector.extract_strided_slice %0 {offsets = [5, 0], sizes = [1, 640], strides = [1, 1]} : vector<6x640xf32> to vector<1x640xf32>
    %6 = vector.broadcast %5 : vector<1x640xf32> to vector<4x640xf32>
    %7 = arith.addf %4, %6 : vector<4x640xf32>
    %8 = vector.extract_strided_slice %1 {offsets = [0, 638], sizes = [4, 2], strides = [1, 1]} : vector<4x640xf32> to vector<4x2xf32>
    %9 = vector.extract_strided_slice %1 {offsets = [0, 0], sizes = [4, 638], strides = [1, 1]} : vector<4x640xf32> to vector<4x638xf32>
    %10 = tpu.concatenate %8, %9 in 1 : vector<4x2xf32>, vector<4x638xf32> -> vector<4x640xf32>
    %11 = vector.extract_strided_slice %0 {offsets = [0, 0], sizes = [1, 640], strides = [1, 1]} : vector<6x640xf32> to vector<1x640xf32>
    %12 = vector.broadcast %11 : vector<1x640xf32> to vector<4x640xf32>
    %13 = arith.mulf %10, %12 : vector<4x640xf32>
    %14 = arith.addf %7, %13 : vector<4x640xf32>
    %15 = vector.extract_strided_slice %1 {offsets = [0, 639], sizes = [4, 1], strides = [1, 1]} : vector<4x640xf32> to vector<4x1xf32>
    %16 = vector.extract_strided_slice %1 {offsets = [0, 0], sizes = [4, 639], strides = [1, 1]} : vector<4x640xf32> to vector<4x639xf32>
    %17 = tpu.concatenate %15, %16 in 1 : vector<4x1xf32>, vector<4x639xf32> -> vector<4x640xf32>
    %18 = vector.extract_strided_slice %0 {offsets = [1, 0], sizes = [1, 640], strides = [1, 1]} : vector<6x640xf32> to vector<1x640xf32>
    %19 = vector.broadcast %18 : vector<1x640xf32> to vector<4x640xf32>
    %20 = arith.mulf %17, %19 : vector<4x640xf32>
    %21 = arith.addf %14, %20 : vector<4x640xf32>
    %22 = vector.extract_strided_slice %1 {offsets = [0, 1], sizes = [4, 639], strides = [1, 1]} : vector<4x640xf32> to vector<4x639xf32>
    %23 = vector.extract_strided_slice %1 {offsets = [0, 0], sizes = [4, 1], strides = [1, 1]} : vector<4x640xf32> to vector<4x1xf32>
    %24 = tpu.concatenate %22, %23 in 1 : vector<4x639xf32>, vector<4x1xf32> -> vector<4x640xf32>
    %25 = vector.extract_strided_slice %0 {offsets = [3, 0], sizes = [1, 640], strides = [1, 1]} : vector<6x640xf32> to vector<1x640xf32>
    %26 = vector.broadcast %25 : vector<1x640xf32> to vector<4x640xf32>
    %27 = arith.mulf %24, %26 : vector<4x640xf32>
    %28 = arith.addf %21, %27 : vector<4x640xf32>
    %29 = vector.extract_strided_slice %1 {offsets = [0, 2], sizes = [4, 638], strides = [1, 1]} : vector<4x640xf32> to vector<4x638xf32>
    %30 = vector.extract_strided_slice %1 {offsets = [0, 0], sizes = [4, 2], strides = [1, 1]} : vector<4x640xf32> to vector<4x2xf32>
    %31 = tpu.concatenate %29, %30 in 1 : vector<4x638xf32>, vector<4x2xf32> -> vector<4x640xf32>
    %32 = vector.extract_strided_slice %0 {offsets = [4, 0], sizes = [1, 640], strides = [1, 1]} : vector<6x640xf32> to vector<1x640xf32>
    %33 = vector.broadcast %32 : vector<1x640xf32> to vector<4x640xf32>
    %34 = arith.mulf %31, %33 : vector<4x640xf32>
    %35 = arith.addf %28, %34 : vector<4x640xf32>
    %c0_3 = arith.constant 0 : index
    %c0_4 = arith.constant 0 : index
    %36 = vector.load %arg3[%c0_3, %c0_4] : memref<4x640xf32, #tpu.memory_space<vmem>>, vector<4x640xf32>
    tpu.vector_store %arg3[%c0_3, %c0_4], %35 {strides = array<i32>} : memref<4x640xf32, #tpu.memory_space<vmem>>, vector<4x640xf32>,
    return
  }
  func.func @transform_0(%arg0: i32) -> (i32, i32) {
    %c0_i32 = arith.constant 0 : i32
    %c0_i32_0 = arith.constant 0 : i32
    %c0_i32_1 = arith.constant 0 : i32
    return %c0_i32, %c0_i32_0 : i32, i32
  }
  func.func @transform_1(%arg0: i32) -> (i32, i32) {
    %c0_i32 = arith.constant 0 : i32
    %c0_i32_0 = arith.constant 0 : i32
    return %arg0, %c0_i32 : i32, i32
  }
  func.func @transform_2(%arg0: i32) -> (i32, i32) {
    %c0_i32 = arith.constant 0 : i32
    %c0_i32_0 = arith.constant 0 : i32
    return %arg0, %c0_i32 : i32, i32
  }
}

</mosaic_0001>

<bundles_post_ra>
// kernel: _update_points_jit.1
= control target key start
LH: loop header
LB: loop body
LE: loop exit
PB: predicated region body
PF: predicated region fallthrough
CT: control target
= control target key end

     0   :  { %s331_s15 = smov 2   ;;  %s332_s16 = smov 1   ;;  %v19_v5 = vlaneseq  ;;  %vm97_vm0 = vcmask 15360   ;;  %vm155_vm1 = vcmask 7168   ;;  %vm212_vm2 = vcmask 1039360   ;;  %s493_s1 = inlined_call_operand.vmem [shape: f32[4,640], index: 1, kind: input, shape index: {}]   ;;  %s494_s0 = inlined_call_operand.vmem [shape: f32[6,640], index: 0, kind: input, shape index: {}]   ;;  %s495_s2 = inlined_call_operand.vmem [shape: f32[4,640], index: 2, kind: output, shape index: {}]  }
   0x1   :  { %v18_v0 = vld [vmem:[%s493_s1 + $0x10] sm:$0xf]  ;;  %v356_v1 = vld [vmem:[%s493_s1 + $0x8] sm:$0xff]  ;;  %v16_v2 = vld [vmem:[%s493_s1] sm:$0xff]  ;;  %s333_s17 = smov 127   ;;  %s334_s1 = smov 126  }
   0x2   :  { %82 = vrot.lane.b32.xlu0 %v18_v0, %s331_s15  ;;  %93 = vrot.lane.b32.xlu1 %v356_v1, %s331_s15  ;;  %v87_v3 = vcombine.high %v16_v2, %v16_v2  ;;  %v88_v4 = vcombine.high %v356_v1, %v356_v1  ;;  %v367_v6 = vshrl.u32 %v19_v5, 7  ;;  %v377_v11 = vld [vmem:[%s494_s0] sm:$0x3f]  ;;  %v382_v13 = vld [vmem:[%s494_s0 + $0x8] sm:$0x3f]  ;;  %vm270_vm3 = vcmask 1031168  }
   0x3   :  { %v387_v14 = vld [vmem:[%s494_s0 + $0x18] sm:$0x3f]  ;;  %v395_v18 = vld [vmem:[%s494_s0 + $0x10] sm:$0x3f]  ;;  %v400_v20 = vld [vmem:[%s494_s0 + $0x20] sm:$0x3f] }
   0x4   :  { %v21_v9 = vsub.s32 2, %v367_v6  ;;  %v52_v15 = vsub.s32 5, %v367_v6  ;;  %v110_v30 = vsub.s32 0, %v367_v6  ;;  %v413_v34 = vsub.s32 1, %v367_v6 }
   0x5   :  { %v419_v44 = vsub.s32 3, %v367_v6 }
   0x6   :  { %89 = vrot.lane.b32.xlu0 %v16_v2, %s331_s15  ;;  %91 = vrot.lane.b32.xlu1 %v87_v3, %s331_s15  ;;  %v22_v16 = vrot.slane %v377_v11, %v21_v9  ;;  %v26_v17 = vrot.slane %v382_v13, %v21_v9  ;;  %v30_v22 = vrot.slane %v395_v18, %v21_v9 }
   0x7   :  { %v34_v23 = vrot.slane %v387_v14, %v21_v9  ;;  %v53_v25 = vrot.slane %v377_v11, %v52_v15  ;;  %v57_v26 = vrot.slane %v382_v13, %v52_v15  ;;  %v38_v27 = vrot.slane %v400_v20, %v21_v9 }
   0x8   :  { %v43_v24 = vcombine.low %v22_v16, %v26_v17  ;;  %v61_v32 = vrot.slane %v395_v18, %v52_v15  ;;  %v65_v33 = vrot.slane %v387_v14, %v52_v15  ;;  %v69_v38 = vrot.slane %v400_v20, %v52_v15 }
   0x9   :  { %v44_v31 = vcombine.low %v30_v22, %v34_v23  ;;  %v74_v36 = vcombine.low %v53_v25, %v57_v26  ;;  %v49_v37 = vmul.f32 %v38_v27, %v18_v0  ;;  %v111_v41 = vrot.slane %v377_v11, %v110_v30 }
   0xa   :  { %95 = vrot.lane.b32.xlu0 %v88_v4, %s331_s15  ;;  %144 = vrot.lane.b32.xlu1 %v18_v0, %s332_s16  ;;  %v47_v35 = vmul.f32 %v43_v24, %v16_v2  ;;  %v75_v43 = vcombine.low %v61_v32, %v65_v33  ;;  %v115_v45 = vrot.slane %v382_v13, %v110_v30 }
   0xb   :  { %v48_v42 = vmul.f32 %v44_v31, %v356_v1  ;;  %v119_v46 = vrot.slane %v395_v18, %v110_v30  ;;  %v123_v47 = vrot.slane %v387_v14, %v110_v30  ;;  %v80_v49 = vadd.f32 %v69_v38, %v49_v37 }
   0xc   :  { %v78_v48 = vadd.f32 %v74_v36, %v47_v35  ;;  %v127_v50 = vrot.slane %v400_v20, %v110_v30  ;;  %v169_v51 = vrot.slane %v377_v11, %v413_v34  ;;  %v173_v54 = vrot.slane %v382_v13, %v413_v34 }
   0xd   :  { %v177_v55 = vrot.slane %v395_v18, %v413_v34  ;;  %v79_v58 = vadd.f32 %v75_v43, %v48_v42  ;;  %v181_v59 = vrot.slane %v387_v14, %v413_v34  ;;  %v185_v60 = vrot.slane %v400_v20, %v413_v34 }
   0xe   :  { %147 = vrot.lane.b32.xlu0 %v16_v2, %s332_s16  ;;  %149 = vrot.lane.b32.xlu1 %v87_v3, %s332_s16  ;;  %v227_v61 = vrot.slane %v377_v11, %v419_v44  ;;  %v231_v63 = vrot.slane %v382_v13, %v419_v44  ;;  %v239_v17 = vrot.slane %v387_v14, %v419_v44 }
  0x12   :  { %151 = vrot.lane.b32.xlu0 %v356_v1, %s332_s16  ;;  %153 = vrot.lane.b32.xlu1 %v88_v4, %s332_s16 }
  0x16   :  { %202 = vrot.lane.b32.xlu0 %v16_v2, %s333_s17  ;;  %204 = vrot.lane.b32.xlu1 %v87_v3, %s333_s17 }
  0x1a   :  { %206 = vrot.lane.b32.xlu0 %v356_v1, %s333_s17  ;;  %208 = vrot.lane.b32.xlu1 %v88_v4, %s333_s17 }
  0x1e   :  { %210 = vrot.lane.b32.xlu0 %v18_v0, %s333_s17  ;;  %260 = vrot.lane.b32.xlu1 %v16_v2, %s334_s1 }
  0x22   :  { %262 = vrot.lane.b32.xlu0 %v87_v3, %s334_s1  ;;  %264 = vrot.lane.b32.xlu1 %v356_v1, %s334_s1  ;;  %v447_v1 = vsub.s32 4, %v367_v6  ;;  %v243_v6 = vrot.slane %v400_v20, %v419_v44 }
  0x24   :  { %v289_v37 = vrot.slane %v382_v13, %v447_v1 }
  0x26   :  { %266 = vrot.lane.b32.xlu0 %v88_v4, %s334_s1  ;;  %268 = vrot.lane.b32.xlu1 %v18_v0, %s334_s1  ;;  %v235_v0 = vrot.slane %v395_v18, %v419_v44  ;;  %v301_v44 = vrot.slane %v400_v20, %v447_v1 }
  0x74   :  { %v369_v7 = vpop.permute.xlu0 %82  ;;  %v371_v8 = vpop.permute.xlu1 %93 }
  0x78   :  { %v90_v10 = vpop.permute.xlu0 %89  ;;  %v92_v12 = vpop.permute.xlu1 %91 }
  0x79   :  { %v107_v52 = vsel %vm97_vm0, %v369_v7, %v90_v10  ;;  %v98_v53 = vsel %vm97_vm0, %v90_v10, %v92_v12  ;;  %v99_v9 = vsel %vm97_vm0, %v92_v12, %v371_v8 }
  0x7a   :  { %v128_v2 = vmul.f32 %v111_v41, %v107_v52  ;;  %v129_v3 = vmul.f32 %v115_v45, %v98_v53  ;;  %v130_v12 = vmul.f32 %v119_v46, %v99_v9 }
  0x7c   :  { %v96_v19 = vpop.permute.xlu0 %95  ;;  %v402_v21 = vpop.permute.xlu1 %144 }
  0x7d   :  { %v100_v62 = vsel %vm97_vm0, %v371_v8, %v96_v19  ;;  %v101_v10 = vsel %vm97_vm0, %v96_v19, %v369_v7  ;;  %v285_v7 = vrot.slane %v377_v11, %v447_v1  ;;  %v137_v19 = vcombine.low %v128_v2, %v129_v3 }
  0x7e   :  { %v131_v22 = vmul.f32 %v123_v47, %v100_v62  ;;  %v132_v27 = vmul.f32 %v127_v50, %v101_v10  ;;  %v293_v11 = vrot.slane %v395_v18, %v447_v1 }
  0x80   :  { %v148_v28 = vpop.permute.xlu0 %147  ;;  %v150_v29 = vpop.permute.xlu1 %149  ;;  %v138_v35 = vcombine.low %v130_v12, %v131_v22  ;;  %v143_v45 = vadd.f32 %v132_v27, %v80_v49 }
  0x81   :  { %v165_v4 = vsel %vm155_vm1, %v402_v21, %v148_v28  ;;  %v156_v5 = vsel %vm155_vm1, %v148_v28, %v150_v29 }
  0x82   :  { %v186_v26 = vmul.f32 %v169_v51, %v165_v4  ;;  %v187_v8 = vmul.f32 %v173_v54, %v156_v5  ;;  %v142_v51 = vadd.f32 %v138_v35, %v79_v58 }
  0x84   :  { %v152_v39 = vpop.permute.xlu0 %151  ;;  %v154_v40 = vpop.permute.xlu1 %153  ;;  %v195_v38 = vcombine.low %v186_v26, %v187_v8 }
  0x85   :  { %v157_v23 = vsel %vm155_vm1, %v150_v29, %v152_v39  ;;  %v158_v24 = vsel %vm155_vm1, %v152_v39, %v154_v40  ;;  %v159_v31 = vsel %vm155_vm1, %v154_v40, %v402_v21  ;;  %v297_v21 = vrot.slane %v387_v14, %v447_v1 }
  0x86   :  { %v188_v30 = vmul.f32 %v177_v55, %v157_v23  ;;  %v189_v29 = vmul.f32 %v181_v59, %v158_v24  ;;  %v141_v40 = vadd.f32 %v137_v19, %v78_v48  ;;  %v190_v42 = vmul.f32 %v185_v60, %v159_v31 }
  0x88   :  { %v203_v56 = vpop.permute.xlu0 %202  ;;  %v205_v57 = vpop.permute.xlu1 %204  ;;  %v196_v46 = vcombine.low %v188_v30, %v189_v29  ;;  %v199_v14 = vadd.f32 %v195_v38, %v141_v40 }
  0x89   :  { %v213_v28 = vsel %vm212_vm2, %v203_v56, %v205_v57 }
  0x8a   :  { %v244_v39 = vmul.f32 %v227_v61, %v213_v28  ;;  %v200_v59 = vadd.f32 %v196_v46, %v142_v51 }
  0x8c   :  { %v207_v15 = vpop.permute.xlu0 %206  ;;  %v209_v16 = vpop.permute.xlu1 %208 }
  0x8d   :  { %v214_v25 = vsel %vm212_vm2, %v205_v57, %v207_v15  ;;  %v215_v43 = vsel %vm212_vm2, %v207_v15, %v209_v16  ;;  %v201_v57 = vadd.f32 %v190_v42, %v143_v45 }
  0x8e   :  { %v245_v32 = vmul.f32 %v231_v63, %v214_v25  ;;  %v246_v48 = vmul.f32 %v235_v0, %v215_v43 }
  0x90   :  { %v211_v33 = vpop.permute.xlu0 %210  ;;  %v261_v34 = vpop.permute.xlu1 %260  ;;  %v253_v13 = vcombine.low %v244_v39, %v245_v32 }
  0x91   :  { %v216_v36 = vsel %vm212_vm2, %v209_v16, %v211_v33  ;;  %v223_v41 = vsel %vm212_vm2, %v211_v33, %v203_v56 }
  0x92   :  { %v247_v47 = vmul.f32 %v239_v17, %v216_v36  ;;  %v248_v52 = vmul.f32 %v243_v6, %v223_v41  ;;  %v257_v60 = vadd.f32 %v253_v13, %v199_v14 }
  0x94   :  { %v263_v50 = vpop.permute.xlu0 %262  ;;  %v265_v18 = vpop.permute.xlu1 %264  ;;  %v254_v20 = vcombine.low %v246_v48, %v247_v47  ;;  %v259_v63 = vadd.f32 %v248_v52, %v201_v57 }
  0x95   :  { %v271_v53 = vsel %vm270_vm3, %v261_v34, %v263_v50  ;;  %v272_v54 = vsel %vm270_vm3, %v263_v50, %v265_v18 }
  0x96   :  { %v302_v55 = vmul.f32 %v285_v7, %v271_v53  ;;  %v303_v56 = vmul.f32 %v289_v37, %v272_v54  ;;  %v258_v9 = vadd.f32 %v254_v20, %v200_v59 }
  0x98   :  { %v311_v49 = vcombine.low %v302_v55, %v303_v56  ;;  %v267_v61 = vpop.permute.xlu0 %266  ;;  %v269_v62 = vpop.permute.xlu1 %268 }
  0x99   :  { %v273_v1 = vsel %vm270_vm3, %v265_v18, %v267_v61  ;;  %v274_v58 = vsel %vm270_vm3, %v267_v61, %v269_v62  ;;  %v281_v2 = vsel %vm270_vm3, %v269_v62, %v261_v34 }
  0x9a   :  { %v315_v3 = vadd.f32 %v311_v49, %v257_v60  ;;  %v304_v4 = vmul.f32 %v293_v11, %v273_v1  ;;  %v305_v5 = vmul.f32 %v297_v21, %v274_v58  ;;  %v306_v0 = vmul.f32 %v301_v44, %v281_v2 }
  0x9c   :  { %318 = vst [vmem:[%s495_s2] sm:$0xff] %v315_v3  ;;  %v312_v10 = vcombine.low %v304_v4, %v305_v5  ;;  %v317_v15 = vadd.f32 %v306_v0, %v259_v63 }
  0x9e   :  { %v316_v16 = vadd.f32 %v312_v10, %v258_v9  ;;  %320 = vst [vmem:[%s495_s2 + $0x10] sm:$0xf] %v317_v15 }
  0xa0   :  { %319 = vst [vmem:[%s495_s2 + $0x8] sm:$0xff] %v316_v16 }

</bundles_post_ra>
